<compile_context>
chip_gen: v6e
topology: v6e:2x2x1
jax: 0.10.0
libtpu: 0.0.40
codegen_flags: <defaults>
</compile_context>

<pallas_src>
import jax
import jax.numpy as jnp
from jax import lax
from jax.experimental import pallas as pl
from jax.experimental.pallas import tpu as pltpu
import numpy as np


def _multi_camera_kernel(img_ref, table_ref, out_ref):
    """img_ref:   [1, B]   int32  (image indices, batch on lanes)
       table_ref: [7+P, N] f32    (qx,qy,qz,qw,tx,ty,tz, proj[P]) x images
       out_ref:   [16+P, B] f32   (row-major flattened 4x4 pose ; projection)
    """
    N = table_ref.shape[1]
    B = img_ref.shape[1]

    # ---- fused gather: one one-hot MXU matmul, batch lands on lanes --------
    onehot = (lax.broadcasted_iota(jnp.int32, (N, B), 0)
              == img_ref[...]).astype(jnp.float32)                 # [N, B]
    g = jnp.dot(table_ref[...], onehot,
                preferred_element_type=jnp.float32)                # [7+P, B]

    qx = g[0:1, :]
    qy = g[1:2, :]
    qz = g[2:3, :]
    qw = g[3:4, :]
    tx = g[4:5, :]
    ty = g[5:6, :]
    tz = g[6:7, :]

    # ---- normalized quaternion -> rotation matrix (lane-dense [1,B] rows) --
    inv_norm = lax.rsqrt(qx * qx + qy * qy + qz * qz + qw * qw)
    x = qx * inv_norm
    y = qy * inv_norm
    z = qz * inv_norm
    w = qw * inv_norm

    # Row-major flattened camera_t_world = [R | t ; 0 0 0 1], one row per store.
    out_ref[0:1, :] = 1.0 - 2.0 * (y * y + z * z)
    out_ref[1:2, :] = 2.0 * (x * y - z * w)
    out_ref[2:3, :] = 2.0 * (x * z + y * w)
    out_ref[3:4, :] = tx
    out_ref[4:5, :] = 2.0 * (x * y + z * w)
    out_ref[5:6, :] = 1.0 - 2.0 * (x * x + z * z)
    out_ref[6:7, :] = 2.0 * (y * z - x * w)
    out_ref[7:8, :] = ty
    out_ref[8:9, :] = 2.0 * (x * z - y * w)
    out_ref[9:10, :] = 2.0 * (y * z + x * w)
    out_ref[10:11, :] = 1.0 - 2.0 * (x * x + y * y)
    out_ref[11:12, :] = tz
    zero = jnp.zeros((1, B), jnp.float32)
    out_ref[12:13, :] = zero
    out_ref[13:14, :] = zero
    out_ref[14:15, :] = zero
    out_ref[15:16, :] = jnp.ones((1, B), jnp.float32)

    # Projection intrinsics (already fused per image) share the output slab.
    out_ref[16:, :] = g[7:, :]


def multi_camera_table_forward(image_idx, pose_params, camera_idx, projection):
    """image_idx: [B] int, pose_params: [N,7] f32 (qx,qy,qz,qw,tx,ty,tz),
    camera_idx: [N] int, projection: [C,P] f32
    -> (camera_t_world [B,4,4] f32, projection_per_image [B,P] f32)."""
    B = int(image_idx.shape[0])
    N = int(pose_params.shape[0])
    P = int(projection.shape[1])

    # Clamp like jnp.take (guards against the NaN-producing all-zero one-hot).
    idx = jnp.clip(image_idx.astype(jnp.int32), 0, N - 1).reshape(1, B)

    # Fuse the two-level gather in the wrapper (trivial XLA gather over N).
    proj_per_image = jnp.take(projection.astype(jnp.float32),
                              camera_idx.astype(jnp.int32), axis=0)   # [N, P]
    # Fused table, transposed so params sit on sublanes, images on lanes.
    table = jnp.concatenate(
        [pose_params.astype(jnp.float32), proj_per_image], axis=-1).T  # [7+P, N]

    out = pl.pallas_call(
        _multi_camera_kernel,
        out_shape=jax.ShapeDtypeStruct((16 + P, B), jnp.float32),
        in_specs=[pl.BlockSpec(memory_space=pltpu.MemorySpace.VMEM),
                  pl.BlockSpec(memory_space=pltpu.MemorySpace.VMEM)],
        out_specs=pl.BlockSpec(memory_space=pltpu.MemorySpace.VMEM),
    )(idx, table)

    poses = out[:16, :].T.reshape(B, 4, 4)
    proj = out[16:, :].T
    return poses, proj


# ---------------- pure-JAX reference (for correctness check) ----------------
def _reference(image_idx, pose_params, camera_idx, projection):
    p = jnp.take(pose_params, image_idx, axis=0)                  # [B, 7]
    q = p[:, 0:4]
    t = p[:, 4:7]
    q = q / jnp.linalg.norm(q, axis=-1, keepdims=True)
    x, y, z, w = q[:, 0], q[:, 1], q[:, 2], q[:, 3]
    R = jnp.stack([
        1 - 2 * (y * y + z * z), 2 * (x * y - z * w), 2 * (x * z + y * w),
        2 * (x * y + z * w), 1 - 2 * (x * x + z * z), 2 * (y * z - x * w),
        2 * (x * z - y * w), 2 * (y * z + x * w), 1 - 2 * (x * x + y * y),
    ], axis=-1).reshape(-1, 3, 3)
    bottom = jnp.tile(jnp.array([[0.0, 0.0, 0.0, 1.0]], jnp.float32),
                      (R.shape[0], 1))[:, None, :]
    pose = jnp.concatenate([jnp.concatenate([R, t[:, :, None]], axis=-1),
                            bottom], axis=1)                      # [B, 4, 4]
    cam = jnp.take(camera_idx, image_idx, axis=0)
    proj = jnp.take(projection, cam, axis=0)
    return pose, proj


if __name__ == "__main__":
    key = jax.random.PRNGKey(0)
    k1, k2, k3, k4, k5 = jax.random.split(key, 5)

    N_images = 12    # number of image poses in the table
    N_cams = 3       # number of distinct camera intrinsics
    P = 4            # projection params per camera (fx, fy, cx, cy)
    B = 8            # batch of image indices queried

    # Deterministic synthetic "parameters" (stand in for __init__ tensors).
    quats = jax.random.normal(k1, (N_images, 4), jnp.float32)
    trans = jax.random.normal(k2, (N_images, 3), jnp.float32)
    pose_params = jnp.concatenate([quats, trans], axis=-1)        # [N, 7]
    camera_idx = jax.random.randint(k3, (N_images,), 0, N_cams, jnp.int32)
    projection = jax.random.uniform(k4, (N_cams, P), jnp.float32,
                                    minval=0.5, maxval=2.0)
    image_idx = jax.random.randint(k5, (B,), 0, N_images, jnp.int32)

    poses, proj = multi_camera_table_forward(image_idx, pose_params,
                                             camera_idx, projection)
    poses = jax.block_until_ready(poses)
    proj = jax.block_until_ready(proj)

    ref_poses, ref_proj = _reference(image_idx, pose_params,
                                     camera_idx, projection)
    np.testing.assert_allclose(np.asarray(poses), np.asarray(ref_poses),
                               rtol=1e-5, atol=1e-5)
    np.testing.assert_allclose(np.asarray(proj), np.asarray(ref_proj),
                               rtol=1e-6, atol=1e-6)

    print("KERNEL_OK")
</pallas_src>

<mosaic_0001>
module attributes {stable_mosaic.version = 11 : i64} {
  func.func @_multi_camera_kernel(%arg0: memref<1x8xi32, #tpu.memory_space<vmem>>, %arg1: memref<11x12xf32, #tpu.memory_space<vmem>>, %arg2: memref<20x8xf32, #tpu.memory_space<vmem>>) attributes {dimension_semantics = [], scalar_prefetch = 0 : i64, scratch_operands = 0 : i64, tpu.core_type = #tpu.core_type<tc>} {
    %0 = tpu.iota {dimensions = array<i32: 0>} : vector<12x8xi32>
    %c0 = arith.constant 0 : index
    %c0_0 = arith.constant 0 : index
    %1 = vector.load %arg0[%c0, %c0_0] : memref<1x8xi32, #tpu.memory_space<vmem>>, vector<1x8xi32>
    %2 = vector.broadcast %1 : vector<1x8xi32> to vector<12x8xi32>
    %3 = arith.cmpi eq, %0, %2 : vector<12x8xi32>
    %4 = arith.extui %3 : vector<12x8xi1> to vector<12x8xi32>
    %5 = arith.sitofp %4 : vector<12x8xi32> to vector<12x8xf32>
    %c0_1 = arith.constant 0 : index
    %c0_2 = arith.constant 0 : index
    %6 = vector.load %arg1[%c0_1, %c0_2] : memref<11x12xf32, #tpu.memory_space<vmem>>, vector<11x12xf32>
    %cst = arith.constant dense<0.000000e+00> : vector<11x8xf32>
    %7 = tpu.matmul %6, %5, %cst {dimension_numbers = #tpu.dot_dimension_numbers<[1], [0], [0], [1], [0, 0, 1, 1], [], []>} : vector<11x12xf32>, vector<12x8xf32>, vector<11x8xf32> -> vector<11x8xf32>
    %8 = vector.extract_strided_slice %7 {offsets = [0, 0], sizes = [1, 8], strides = [1, 1]} : vector<11x8xf32> to vector<1x8xf32>
    %9 = vector.extract_strided_slice %7 {offsets = [1, 0], sizes = [1, 8], strides = [1, 1]} : vector<11x8xf32> to vector<1x8xf32>
    %10 = vector.extract_strided_slice %7 {offsets = [2, 0], sizes = [1, 8], strides = [1, 1]} : vector<11x8xf32> to vector<1x8xf32>
    %11 = vector.extract_strided_slice %7 {offsets = [3, 0], sizes = [1, 8], strides = [1, 1]} : vector<11x8xf32> to vector<1x8xf32>
    %12 = vector.extract_strided_slice %7 {offsets = [4, 0], sizes = [1, 8], strides = [1, 1]} : vector<11x8xf32> to vector<1x8xf32>
    %13 = vector.extract_strided_slice %7 {offsets = [5, 0], sizes = [1, 8], strides = [1, 1]} : vector<11x8xf32> to vector<1x8xf32>
    %14 = vector.extract_strided_slice %7 {offsets = [6, 0], sizes = [1, 8], strides = [1, 1]} : vector<11x8xf32> to vector<1x8xf32>
    %15 = arith.mulf %8, %8 : vector<1x8xf32>
    %16 = arith.mulf %9, %9 : vector<1x8xf32>
    %17 = arith.addf %15, %16 : vector<1x8xf32>
    %18 = arith.mulf %10, %10 : vector<1x8xf32>
    %19 = arith.addf %17, %18 : vector<1x8xf32>
    %20 = arith.mulf %11, %11 : vector<1x8xf32>
    %21 = arith.addf %19, %20 : vector<1x8xf32>
    %22 = math.rsqrt %21 : vector<1x8xf32>
    %23 = arith.mulf %8, %22 : vector<1x8xf32>
    %24 = arith.mulf %9, %22 : vector<1x8xf32>
    %25 = arith.mulf %10, %22 : vector<1x8xf32>
    %26 = arith.mulf %11, %22 : vector<1x8xf32>
    %27 = arith.mulf %24, %24 : vector<1x8xf32>
    %28 = arith.mulf %25, %25 : vector<1x8xf32>
    %29 = arith.addf %27, %28 : vector<1x8xf32>
    %cst_3 = arith.constant 2.000000e+00 : f32
    %30 = vector.broadcast %cst_3 : f32 to vector<1x8xf32>
    %31 = arith.mulf %30, %29 : vector<1x8xf32>
    %cst_4 = arith.constant 1.000000e+00 : f32
    %32 = vector.broadcast %cst_4 : f32 to vector<1x8xf32>
    %33 = arith.subf %32, %31 : vector<1x8xf32>
    %c0_5 = arith.constant 0 : index
    %c0_6 = arith.constant 0 : index
    %34 = vector.load %arg2[%c0_5, %c0_6] : memref<20x8xf32, #tpu.memory_space<vmem>>, vector<1x8xf32>
    tpu.vector_store %arg2[%c0_5, %c0_6], %33 {strides = array<i32>} : memref<20x8xf32, #tpu.memory_space<vmem>>, vector<1x8xf32>,
    %35 = arith.mulf %23, %24 : vector<1x8xf32>
    %36 = arith.mulf %25, %26 : vector<1x8xf32>
    %37 = arith.subf %35, %36 : vector<1x8xf32>
    %cst_7 = arith.constant 2.000000e+00 : f32
    %38 = vector.broadcast %cst_7 : f32 to vector<1x8xf32>
    %39 = arith.mulf %38, %37 : vector<1x8xf32>
    %c1 = arith.constant 1 : index
    %c0_8 = arith.constant 0 : index
    %40 = vector.load %arg2[%c1, %c0_8] : memref<20x8xf32, #tpu.memory_space<vmem>>, vector<1x8xf32>
    tpu.vector_store %arg2[%c1, %c0_8], %39 {strides = array<i32>} : memref<20x8xf32, #tpu.memory_space<vmem>>, vector<1x8xf32>,
    %41 = arith.mulf %23, %25 : vector<1x8xf32>
    %42 = arith.mulf %24, %26 : vector<1x8xf32>
    %43 = arith.addf %41, %42 : vector<1x8xf32>
    %cst_9 = arith.constant 2.000000e+00 : f32
    %44 = vector.broadcast %cst_9 : f32 to vector<1x8xf32>
    %45 = arith.mulf %44, %43 : vector<1x8xf32>
    %c2 = arith.constant 2 : index
    %c0_10 = arith.constant 0 : index
    %46 = vector.load %arg2[%c2, %c0_10] : memref<20x8xf32, #tpu.memory_space<vmem>>, vector<1x8xf32>
    tpu.vector_store %arg2[%c2, %c0_10], %45 {strides = array<i32>} : memref<20x8xf32, #tpu.memory_space<vmem>>, vector<1x8xf32>,
    %c3 = arith.constant 3 : index
    %c0_11 = arith.constant 0 : index
    %47 = vector.load %arg2[%c3, %c0_11] : memref<20x8xf32, #tpu.memory_space<vmem>>, vector<1x8xf32>
    tpu.vector_store %arg2[%c3, %c0_11], %12 {strides = array<i32>} : memref<20x8xf32, #tpu.memory_space<vmem>>, vector<1x8xf32>,
    %48 = arith.mulf %23, %24 : vector<1x8xf32>
    %49 = arith.mulf %25, %26 : vector<1x8xf32>
    %50 = arith.addf %48, %49 : vector<1x8xf32>
    %cst_12 = arith.constant 2.000000e+00 : f32
    %51 = vector.broadcast %cst_12 : f32 to vector<1x8xf32>
    %52 = arith.mulf %51, %50 : vector<1x8xf32>
    %c4 = arith.constant 4 : index
    %c0_13 = arith.constant 0 : index
    %53 = vector.load %arg2[%c4, %c0_13] : memref<20x8xf32, #tpu.memory_space<vmem>>, vector<1x8xf32>
    tpu.vector_store %arg2[%c4, %c0_13], %52 {strides = array<i32>} : memref<20x8xf32, #tpu.memory_space<vmem>>, vector<1x8xf32>,
    %54 = arith.mulf %23, %23 : vector<1x8xf32>
    %55 = arith.mulf %25, %25 : vector<1x8xf32>
    %56 = arith.addf %54, %55 : vector<1x8xf32>
    %cst_14 = arith.constant 2.000000e+00 : f32
    %57 = vector.broadcast %cst_14 : f32 to vector<1x8xf32>
    %58 = arith.mulf %57, %56 : vector<1x8xf32>
    %cst_15 = arith.constant 1.000000e+00 : f32
    %59 = vector.broadcast %cst_15 : f32 to vector<1x8xf32>
    %60 = arith.subf %59, %58 : vector<1x8xf32>
    %c5 = arith.constant 5 : index
    %c0_16 = arith.constant 0 : index
    %61 = vector.load %arg2[%c5, %c0_16] : memref<20x8xf32, #tpu.memory_space<vmem>>, vector<1x8xf32>
    tpu.vector_store %arg2[%c5, %c0_16], %60 {strides = array<i32>} : memref<20x8xf32, #tpu.memory_space<vmem>>, vector<1x8xf32>,
    %62 = arith.mulf %24, %25 : vector<1x8xf32>
    %63 = arith.mulf %23, %26 : vector<1x8xf32>
    %64 = arith.subf %62, %63 : vector<1x8xf32>
    %cst_17 = arith.constant 2.000000e+00 : f32
    %65 = vector.broadcast %cst_17 : f32 to vector<1x8xf32>
    %66 = arith.mulf %65, %64 : vector<1x8xf32>
    %c6 = arith.constant 6 : index
    %c0_18 = arith.constant 0 : index
    %67 = vector.load %arg2[%c6, %c0_18] : memref<20x8xf32, #tpu.memory_space<vmem>>, vector<1x8xf32>
    tpu.vector_store %arg2[%c6, %c0_18], %66 {strides = array<i32>} : memref<20x8xf32, #tpu.memory_space<vmem>>, vector<1x8xf32>,
    %c7 = arith.constant 7 : index
    %c0_19 = arith.constant 0 : index
    %68 = vector.load %arg2[%c7, %c0_19] : memref<20x8xf32, #tpu.memory_space<vmem>>, vector<1x8xf32>
    tpu.vector_store %arg2[%c7, %c0_19], %13 {strides = array<i32>} : memref<20x8xf32, #tpu.memory_space<vmem>>, vector<1x8xf32>,
    %69 = arith.mulf %23, %25 : vector<1x8xf32>
    %70 = arith.mulf %24, %26 : vector<1x8xf32>
    %71 = arith.subf %69, %70 : vector<1x8xf32>
    %cst_20 = arith.constant 2.000000e+00 : f32
    %72 = vector.broadcast %cst_20 : f32 to vector<1x8xf32>
    %73 = arith.mulf %72, %71 : vector<1x8xf32>
    %c8 = arith.constant 8 : index
    %c0_21 = arith.constant 0 : index
    %74 = vector.load %arg2[%c8, %c0_21] : memref<20x8xf32, #tpu.memory_space<vmem>>, vector<1x8xf32>
    tpu.vector_store %arg2[%c8, %c0_21], %73 {strides = array<i32>} : memref<20x8xf32, #tpu.memory_space<vmem>>, vector<1x8xf32>,
    %75 = arith.mulf %24, %25 : vector<1x8xf32>
    %76 = arith.mulf %23, %26 : vector<1x8xf32>
    %77 = arith.addf %75, %76 : vector<1x8xf32>
    %cst_22 = arith.constant 2.000000e+00 : f32
    %78 = vector.broadcast %cst_22 : f32 to vector<1x8xf32>
    %79 = arith.mulf %78, %77 : vector<1x8xf32>
    %c9 = arith.constant 9 : index
    %c0_23 = arith.constant 0 : index
    %80 = vector.load %arg2[%c9, %c0_23] : memref<20x8xf32, #tpu.memory_space<vmem>>, vector<1x8xf32>
    tpu.vector_store %arg2[%c9, %c0_23], %79 {strides = array<i32>} : memref<20x8xf32, #tpu.memory_space<vmem>>, vector<1x8xf32>,
    %81 = arith.mulf %23, %23 : vector<1x8xf32>
    %82 = arith.mulf %24, %24 : vector<1x8xf32>
    %83 = arith.addf %81, %82 : vector<1x8xf32>
    %cst_24 = arith.constant 2.000000e+00 : f32
    %84 = vector.broadcast %cst_24 : f32 to vector<1x8xf32>
    %85 = arith.mulf %84, %83 : vector<1x8xf32>
    %cst_25 = arith.constant 1.000000e+00 : f32
    %86 = vector.broadcast %cst_25 : f32 to vector<1x8xf32>
    %87 = arith.subf %86, %85 : vector<1x8xf32>
    %c10 = arith.constant 10 : index
    %c0_26 = arith.constant 0 : index
    %88 = vector.load %arg2[%c10, %c0_26] : memref<20x8xf32, #tpu.memory_space<vmem>>, vector<1x8xf32>
    tpu.vector_store %arg2[%c10, %c0_26], %87 {strides = array<i32>} : memref<20x8xf32, #tpu.memory_space<vmem>>, vector<1x8xf32>,
    %c11 = arith.constant 11 : index
    %c0_27 = arith.constant 0 : index
    %89 = vector.load %arg2[%c11, %c0_27] : memref<20x8xf32, #tpu.memory_space<vmem>>, vector<1x8xf32>
    tpu.vector_store %arg2[%c11, %c0_27], %14 {strides = array<i32>} : memref<20x8xf32, #tpu.memory_space<vmem>>, vector<1x8xf32>,
    %cst_28 = arith.constant 0.000000e+00 : f32
    %90 = vector.broadcast %cst_28 : f32 to vector<1x8xf32>
    %c12 = arith.constant 12 : index
    %c0_29 = arith.constant 0 : index
    %91 = vector.load %arg2[%c12, %c0_29] : memref<20x8xf32, #tpu.memory_space<vmem>>, vector<1x8xf32>
    tpu.vector_store %arg2[%c12, %c0_29], %90 {strides = array<i32>} : memref<20x8xf32, #tpu.memory_space<vmem>>, vector<1x8xf32>,
    %c13 = arith.constant 13 : index
    %c0_30 = arith.constant 0 : index
    %92 = vector.load %arg2[%c13, %c0_30] : memref<20x8xf32, #tpu.memory_space<vmem>>, vector<1x8xf32>
    tpu.vector_store %arg2[%c13, %c0_30], %90 {strides = array<i32>} : memref<20x8xf32, #tpu.memory_space<vmem>>, vector<1x8xf32>,
    %c14 = arith.constant 14 : index
    %c0_31 = arith.constant 0 : index
    %93 = vector.load %arg2[%c14, %c0_31] : memref<20x8xf32, #tpu.memory_space<vmem>>, vector<1x8xf32>
    tpu.vector_store %arg2[%c14, %c0_31], %90 {strides = array<i32>} : memref<20x8xf32, #tpu.memory_space<vmem>>, vector<1x8xf32>,
    %cst_32 = arith.constant 1.000000e+00 : f32
    %94 = vector.broadcast %cst_32 : f32 to vector<1x8xf32>
    %c15 = arith.constant 15 : index
    %c0_33 = arith.constant 0 : index
    %95 = vector.load %arg2[%c15, %c0_33] : memref<20x8xf32, #tpu.memory_space<vmem>>, vector<1x8xf32>
    tpu.vector_store %arg2[%c15, %c0_33], %94 {strides = array<i32>} : memref<20x8xf32, #tpu.memory_space<vmem>>, vector<1x8xf32>,
    %96 = vector.extract_strided_slice %7 {offsets = [7, 0], sizes = [4, 8], strides = [1, 1]} : vector<11x8xf32> to vector<4x8xf32>
    %c16 = arith.constant 16 : index
    %c0_34 = arith.constant 0 : index
    %97 = vector.load %arg2[%c16, %c0_34] : memref<20x8xf32, #tpu.memory_space<vmem>>, vector<4x8xf32>
    tpu.vector_store %arg2[%c16, %c0_34], %96 {strides = array<i32>} : memref<20x8xf32, #tpu.memory_space<vmem>>, vector<4x8xf32>,
    return
  }
}

</mosaic_0001>

<bundles_post_ra>
// kernel: tpu_custom_call.1
= control target key start
LH: loop header
LB: loop body
LE: loop exit
PB: predicated region body
PF: predicated region fallthrough
CT: control target
= control target key end

     0   :  { %7 = vsyncpa [#allocation3], 0  ;;  %s419_s0 = inlined_call_operand.hbm [shape: s32[1,8], index: 0, kind: input, shape index: {}]   ;;  %s420_s1 = inlined_call_operand.hbm [shape: f32[11,12], index: 1, kind: input, shape index: {}]   ;;  %s421_s2 = inlined_call_operand.vmem [shape: f32[20,8], index: 2, kind: output, shape index: {}]  }
   0x1   :  { %8 = vsyncpa [#allocation5], 0  ;;  %s325_s9 = smov [#allocation2]   ;;  %s326_s11 = smov [#allocation4]  }
   0x2   :  { %s15_s10 = sshll.u32 %s325_s9, 4  ;;  %s24_s12 = sshll.u32 %s326_s11, 4  ;;  %s16_s10 = int_to_ptr.vmem [resolvable:$true] %s15_s10  ;;  %s25_s12 = int_to_ptr.vmem [resolvable:$true] %s24_s12 }
   0x3   :  { %s289_s13 = scalar_lea.vmem %s16_s10, 16  ;;  %s293_s14 = scalar_lea.vmem %s16_s10, 32 }
   0x4   :  { %p290_p0 = scmp.ne.s32.totalorder %s16_s10, %s289_s13  ;;  %p294_p1 = scmp.lt.s32.totalorder %s16_s10, %s16_s10 }
   0x5   :  { %p295_p2 = scmp.lt.s32.totalorder %s293_s14, %s289_s13 }
   0x7   :  { %p296_p3 = por %p295_p2, %p294_p1 }
   0x9   :  { %p297_p4 = pnand %p296_p3, %p290_p0 }
   0xb   :  { %300 = shalt.err (!%p297_p4)
}
   0xc   :  { %18 = dma.hbm_to_vmem [thread:$0]  %s419_s0, 16, %s16_s10, [#allocation3]  }
   0xd   :  { %s309_s17 = scalar_lea.vmem %s25_s12, 256  ;;  %p314_p6 = scmp.lt.s32.totalorder %s25_s12, %s25_s12 }
   0xe   :  { %p310_p5 = scmp.ne.s32.totalorder %s25_s12, %s309_s17  ;;  %p315_p7 = scmp.lt.s32.totalorder %s309_s17, %s309_s17 }
  0x10   :  { %p316_p8 = por %p315_p7, %p314_p6 }
  0x12   :  { %p317_p9 = pnand %p316_p8, %p310_p5 }
  0x14   :  { %320 = shalt.err (!%p317_p9)
}
  0x15   :  { %s327_s18 = smov 128   ;;  %s328_s19 = smov 8  }
  0x16   :  { %30 = dma.hbm_to_vmem [thread:$0]  %s420_s1, 256, %s25_s12, [#allocation5], %s327_s18, %s327_s18, %s328_s19  }
  0x17   :  { %321 = dma.done.wait [#allocation3], 16  }
  0x18   :  { %322 = vsyncadd [#allocation3], 4294967280 }
  0x19   :  { %323 = dma.done.wait [#allocation5], 256  }
  0x1a   :  { %324 = vsyncadd [#allocation5], 4294967040  ;;  %v37_v0 = vlaneseq  ;;  %vm185_vm0 = vcmask 57344   ;;  %v329_v1 = vmov 0.0   ;;  %v330_v3 = vmov 1.0   ;;  %v51_v6 = vld [vmem:[#allocation4] sm:$0xff] }
  0x1b   :  { %241 = vst.msk [vmem:[%s421_s2 + $0xc] sm:$0x1] %vm185_vm0, %v329_v1  ;;  %242 = vst.msk [vmem:[%s421_s2 + $0xd] sm:$0x1] %vm185_vm0, %v329_v1  ;;  %vm53_vm1 = vcmask 97280   ;;  %vm60_vm2 = vcmask 1043456  }
  0x1c   :  { %243 = vst.msk [vmem:[%s421_s2 + $0xe] sm:$0x1] %vm185_vm0, %v329_v1  ;;  %v38_v2 = vshrl.u32 %v37_v0, 7  ;;  %244 = vst.msk [vmem:[%s421_s2 + $0xf] sm:$0x1] %vm185_vm0, %v330_v3  ;;  %270 = vmatprep.mubr.msk.f32.mxu0 %vm53_vm1, %v51_v6  ;;  %vm247_vm5 = vcmask 59392  }
  0x1d   :  { %v255_v5 = vld [vmem:[#allocation2] ss:$0 sm:$0xff]  ;;  %v52_v8 = vld [vmem:[#allocation4 + $0x8] sm:$0x7]  ;;  %vm200_vm6 = vcmask 61444   ;;  %vm224_vm7 = vcmask 62469  }
  0x1e   :  { %v39_v4 = vadd.s32 8, %v38_v2  ;;  %vm45_vm4 = vcmp.eq.s32.totalorder %v38_v2, %v255_v5  ;;  %vm239_vm8 = vcmask 63494   ;;  %vm245_vm9 = vcmask 64519  }
  0x1f   :  { %vm170_vm10 = vcmask 58369  }
  0x20   :  { %vm46_vm3 = vcmp.eq.s32.totalorder %v39_v4, %v255_v5 }
  0x21   :  { %v257_v7 = vsel %vm46_vm3, 1.0, %v329_v1 }
  0x22   :  { %266 = vmatprep.subr.msk.mxu0 %vm60_vm2, %v257_v7 }
  0x23   :  { %267 = vmatpush3.msk.msra.mxu0 %vm60_vm2, %v257_v7 }
  0x24   :  { %268 = vmatprep.subr.msk.mxu0 %vm45_vm4, %v330_v3 }
  0x25   :  { %269 = vmatpush3.msk.msra.mxu0 %vm45_vm4, %v330_v3 }
  0x26   :  { %271 = vmatmul.mubr.msk.f32.vlgmr.msra.gmra.mxu0 %vm53_vm1, %v52_v8 }
  0xe6   :  { %v272_v9 = vpop.f32.mrf.mxu0 }
  0xe7   :  { %248 = vst.msk [vmem:[%s421_s2 + $0x11] sm:$0x7] %vm247_vm5, %v272_v9 }
  0xe8   :  { %v130_v10 = vpop.f32.mrf.mxu0 }
  0xe9   :  { %v139_v11 = vmul.f32 %v130_v10, %v130_v10  ;;  %201 = vst.msk [vmem:[%s421_s2 - $0x1] sm:$0x10] %vm200_vm6, %v130_v10 }
  0xea   :  { %225 = vst.msk [vmem:[%s421_s2 + $0x2] sm:$0x20] %vm224_vm7, %v130_v10 }
  0xeb   :  { %240 = vst.msk [vmem:[%s421_s2 + $0x5] sm:$0x40] %vm239_vm8, %v130_v10  ;;  %v141_v12 = vrot.slane %v139_v11, 1  ;;  %v144_v14 = vrot.slane %v139_v11, 2  ;;  %v147_v16 = vrot.slane %v139_v11, 3 }
  0xec   :  { %246 = vst.msk [vmem:[%s421_s2 + $0x9] sm:$0x80] %vm245_vm9, %v130_v10 }
  0xed   :  { %v143_v13 = vadd.f32 %v141_v12, %v139_v11 }
  0xef   :  { %v146_v15 = vadd.f32 %v144_v14, %v143_v13 }
  0xf1   :  { %v149_v17 = vadd.f32 %v147_v16, %v146_v15 }
  0xf3   :  { %279 = vrsqrt.f32 %v149_v17 }
 0x100   :  { %v280_v18 = vpop.eup %279 }
 0x101   :  { %v153_v19 = vrot.slane %v280_v18, 7  ;;  %v156_v20 = vrot.slane %v280_v18, 6  ;;  %v159_v21 = vrot.slane %v280_v18, 5  ;;  %v151_v22 = vmul.f32 %v280_v18, %v130_v10 }
 0x103   :  { %v155_v23 = vmul.f32 %v153_v19, %v130_v10  ;;  %v158_v24 = vmul.f32 %v156_v20, %v130_v10  ;;  %v161_v25 = vmul.f32 %v159_v21, %v130_v10  ;;  %v205_v36 = vmul.f32 %v151_v22, %v151_v22 }
 0x105   :  { %v162_v26 = vmul.f32 %v155_v23, %v155_v23  ;;  %v163_v27 = vmul.f32 %v158_v24, %v158_v24  ;;  %v173_v28 = vrot.slane %v155_v23, 1  ;;  %v177_v29 = vrot.slane %v161_v25, 1 }
 0x106   :  { %v188_v30 = vrot.slane %v158_v24, 2  ;;  %v191_v31 = vrot.slane %v161_v25, 2  ;;  %v212_v32 = vrot.slane %v158_v24, 1  ;;  %v215_v33 = vrot.slane %v161_v25, 3 }
 0x107   :  { %v165_v34 = vrot.slane %v163_v27, 1  ;;  %v179_v35 = vmul.f32 %v177_v29, %v158_v24  ;;  %v206_v37 = vrot.slane %v163_v27, 2  ;;  %v175_v38 = vmul.f32 %v173_v28, %v151_v22 }
 0x108   :  { %v193_v39 = vmul.f32 %v191_v31, %v155_v23  ;;  %v217_v40 = vmul.f32 %v215_v33, %v151_v22  ;;  %v190_v43 = vmul.f32 %v188_v30, %v151_v22  ;;  %v214_v46 = vmul.f32 %v212_v32, %v155_v23 }
 0x109   :  { %v167_v41 = vadd.f32 %v165_v34, %v162_v26  ;;  %v181_v42 = vrot.slane %v179_v35, 2  ;;  %v208_v44 = vadd.f32 %v206_v37, %v205_v36  ;;  %v233_v48 = vrot.slane %v162_v26, 1 }
 0x10a   :  { %v195_v45 = vrot.slane %v193_v39, 1  ;;  %v219_v47 = vrot.slane %v217_v40, 7 }
 0x10b   :  { %v168_v49 = vmul.f32 2.0, %v167_v41  ;;  %v183_v50 = vsub.f32 %v175_v38, %v181_v42  ;;  %v202_v51 = vadd.f32 %v181_v42, %v175_v38  ;;  %v209_v52 = vmul.f32 2.0, %v208_v44 }
 0x10c   :  { %v197_v53 = vadd.f32 %v195_v45, %v190_v43  ;;  %v221_v54 = vsub.f32 %v214_v46, %v219_v47  ;;  %v226_v55 = vsub.f32 %v190_v43, %v195_v45  ;;  %v229_v56 = vadd.f32 %v219_v47, %v214_v46 }
 0x10d   :  { %v169_v57 = vsub.f32 1.0, %v168_v49  ;;  %v184_v58 = vmul.f32 2.0, %v183_v50  ;;  %v203_v59 = vmul.f32 2.0, %v202_v51  ;;  %v210_v60 = vsub.f32 1.0, %v209_v52 }
 0x10e   :  { %v198_v61 = vmul.f32 2.0, %v197_v53  ;;  %v222_v62 = vmul.f32 2.0, %v221_v54  ;;  %v227_v63 = vmul.f32 2.0, %v226_v55  ;;  %v230_v0 = vmul.f32 2.0, %v229_v56 }
 0x10f   :  { %171 = vst.msk [vmem:[%s421_s2 - $0x1] sm:$0x2] %vm170_vm10, %v169_v57  ;;  %v235_v1 = vadd.f32 %v233_v48, %v205_v36 }
 0x110   :  { %186 = vst.msk [vmem:[%s421_s2 + $0x1] sm:$0x1] %vm185_vm0, %v184_v58  ;;  %204 = vst.msk [vmem:[%s421_s2 + $0x4] sm:$0x1] %vm185_vm0, %v203_v59 }
 0x111   :  { %211 = vst.msk [vmem:[%s421_s2 + $0x5] sm:$0x1] %vm185_vm0, %v210_v60  ;;  %199 = vst.msk [vmem:[%s421_s2 + $0x2] sm:$0x1] %vm185_vm0, %v198_v61  ;;  %v236_v2 = vmul.f32 2.0, %v235_v1 }
 0x112   :  { %223 = vst.msk [vmem:[%s421_s2 + $0x5] sm:$0x2] %vm170_vm10, %v222_v62  ;;  %231 = vst.msk [vmem:[%s421_s2 + $0x8] sm:$0x2] %vm170_vm10, %v230_v0 }
 0x113   :  { %228 = vst.msk [vmem:[%s421_s2 + $0x8] sm:$0x1] %vm185_vm0, %v227_v63  ;;  %v237_v3 = vsub.f32 1.0, %v236_v2 }
 0x115   :  { %238 = vst.msk [vmem:[%s421_s2 + $0xa] sm:$0x1] %vm185_vm0, %v237_v3 }
 0x116   :  { %253 = vsyncpa [#allocation3], 1 }
 0x117   :  { %254 = vsyncpa [#allocation5], 1 }

</bundles_post_ra>
